<compile_context>
chip_gen: v7x
topology: tpu7x:2x2x1
jax: 0.10.0
libtpu: 0.0.40
codegen_flags: <defaults>
</compile_context>

<pallas_src>
import math

import jax
import jax.numpy as jnp
from jax.experimental import pallas as pl
from jax.experimental.pallas import tpu as pltpu


def _adaptive_bounds(in_size: int, out_size: int, idx: int):
    """PyTorch AdaptiveMaxPool2d region bounds for output index `idx`."""
    start = (idx * in_size) // out_size
    end = math.ceil((idx + 1) * in_size / out_size)
    return start, end


def _level_offset(level: int) -> int:
    """Offset of `level`'s first cell in the concatenated cell axis."""
    return sum(m * m for m in range(1, level))


def _cdiv(a: int, b: int) -> int:
    return -(-a // b)


def _round_up(x: int, m: int) -> int:
    return _cdiv(x, m) * m


def _make_spp_kernel(num_levels: int, C: int, H: int, W: int):
    """Kernel body with pooling regions baked in statically.

    x_ref: (TN, C, H, W) VMEM block — native NCHW (W on lanes, H on sublanes).
    o_ref: (TN, S, C) VMEM block, S = sum(level^2); cell (level, j, k) is stored
           at index _level_offset(level) + j*level + k along axis 1.
    """

    def kernel(x_ref, o_ref):
        finest_cells = None  # list of (TN, 1, C) cells of level == num_levels

        # Iterate finest -> coarsest so level 1 can reuse the finest level.
        for i in range(num_levels - 1, -1, -1):
            level = i + 1
            off = _level_offset(level)

            if level == 1 and finest_cells is not None:
                # Global max == max over the finest level's cells (full cover).
                # Valid for max pooling only.
                g = finest_cells[0]
                for c in finest_cells[1:]:
                    g = jnp.maximum(g, c)
                o_ref[:, off:off + 1, :] = g
                continue

            cells = []
            for j in range(level):
                hs, he = _adaptive_bounds(H, level, j)
                # Pass 1 (bulk of the work): reduce this H-segment across the
                # full W, sliced straight from the ref (no whole-tile load).
                strip = jnp.max(x_ref[:, :, hs:he, :], axis=2)      # (TN, C, W)
                for k in range(level):
                    ws, we = _adaptive_bounds(W, level, k)
                    # Pass 2: lane reduction on the tiny strip only.
                    cell = jnp.max(strip[:, :, ws:we], axis=2)      # (TN, C)
                    cell = cell[:, None, :]                         # (TN, 1, C)
                    cells.append(cell)
                    idx = off + j * level + k
                    o_ref[:, idx:idx + 1, :] = cell

            if level == num_levels:
                finest_cells = cells

    return kernel


def _tiling_policy(N: int, C: int, H: int, W: int, S: int, itemsize: int):
    """Choose samples-per-block TN and a VMEM limit, per TPU generation."""
    try:
        kind = jax.devices()[0].device_kind.lower()
    except Exception:  # pragma: no cover - defensive
        kind = ""
    is_v7 = "7" in kind                           # v7x: 64 MiB VMEM, 2 TCs
    two_tc = is_v7 or ("v4" in kind) or ("v5p" in kind)

    # VMEM footprint of one sample, including (sublane,128)-lane tile padding.
    # (bf16 packs 16 sublanes/vreg; no bf16 VALU on v5e -> keep compute minimal
    #  and stay HBM-limited regardless of dtype.)
    sublane = {4: 8, 2: 16, 1: 32}.get(itemsize, 8)
    in_bytes = C * _round_up(H, sublane) * _round_up(W, 128) * itemsize
    out_bytes = _round_up(S, sublane) * _round_up(C, 128) * itemsize
    per_sample = in_bytes + out_bytes

    if is_v7:
        block_budget = 6 * 1024 * 1024            # 64 MiB physical VMEM
        vmem_limit = 48 * 1024 * 1024
        vmem_cap = 56 * 1024 * 1024
    else:                                         # v5e / v6e: 128 MiB VMEM
        block_budget = 12 * 1024 * 1024
        vmem_limit = 80 * 1024 * 1024
        vmem_cap = 112 * 1024 * 1024

    cap = max(1, block_budget // per_sample)
    if two_tc and N >= 2:
        # Keep an even, balanced step count so both TensorCores get work.
        steps = max(_cdiv(N, cap), 2)
        steps = min(_round_up(steps, 2), N)
        tn = _cdiv(N, steps)
    else:
        # Single TensorCore: just fill the block budget (fewer grid steps).
        tn = min(N, cap)
    tn = max(1, min(tn, N))

    # Pallas double-buffers both the input and the output block.
    needed = 2 * tn * per_sample + (2 << 20)
    if needed > vmem_limit:
        # TODO(synk): for samples too large even at TN=1, tile H on a second
        # ("arbitrary") grid axis with running-max scratch instead of only
        # raising the VMEM limit.
        vmem_limit = min(_round_up(needed, 1 << 20), vmem_cap)
    return tn, int(vmem_limit)


def spp_layer(x: jax.Array, num_levels: int, pool_type: str = "max_pool") -> jax.Array:
    """Pallas TPU implementation of SPPLayer.forward (max_pool)."""
    assert pool_type == "max_pool", "only max_pool implemented"
    # TODO(synk): avg_pool variant not implemented (module default is max_pool).
    N, C, H, W = x.shape
    S = sum((i + 1) ** 2 for i in range(num_levels))
    itemsize = jnp.dtype(x.dtype).itemsize

    TN, vmem_limit = _tiling_policy(N, C, H, W, S, itemsize)
    grid = (_cdiv(N, TN),)

    kernel = _make_spp_kernel(num_levels, C, H, W)

    pooled = pl.pallas_call(
        kernel,
        out_shape=jax.ShapeDtypeStruct((N, S, C), x.dtype),
        grid_spec=pltpu.PrefetchScalarGridSpec(
            num_scalar_prefetch=0,
            grid=grid,
            in_specs=[pl.BlockSpec((TN, C, H, W), lambda n: (n, 0, 0, 0))],
            out_specs=pl.BlockSpec((TN, S, C), lambda n: (n, 0, 0)),
        ),
        compiler_params=pltpu.CompilerParams(
            dimension_semantics=("parallel",),
            vmem_limit_bytes=vmem_limit,
        ),
    )(x)

    # Re-assemble torch ordering: per level (N, level^2, C) -> (N, C, level^2)
    # -> flatten; concat levels. Pure layout plumbing on the tiny pooled tensor.
    pieces = []
    off = 0
    for i in range(num_levels):
        level = i + 1
        s = level * level
        blk = pooled[:, off:off + s, :]                       # (N, s, C)
        pieces.append(jnp.transpose(blk, (0, 2, 1)).reshape(N, C * s))
        off += s
    return jnp.concatenate(pieces, axis=1)                    # (N, F)


def _spp_reference(x: jnp.ndarray, num_levels: int) -> jnp.ndarray:
    """Pure-JAX reference matching PyTorch AdaptiveMaxPool2d + view/cat."""
    N, C, H, W = x.shape
    outs = []
    for i in range(num_levels):
        level = i + 1
        cells = []
        for j in range(level):
            hs, he = _adaptive_bounds(H, level, j)
            row = []
            for k in range(level):
                ws, we = _adaptive_bounds(W, level, k)
                row.append(jnp.max(x[:, :, hs:he, ws:we], axis=(2, 3)))
            cells.append(jnp.stack(row, axis=-1))             # (N, C, level)
        pooled = jnp.stack(cells, axis=-2)                    # (N, C, level, level)
        outs.append(pooled.reshape(N, -1))
    return jnp.concatenate(outs, axis=1)


if __name__ == "__main__":
    key = jax.random.PRNGKey(0)
    N, C, H, W = 2, 4, 16, 16
    num_levels = 3
    x = jax.random.normal(key, (N, C, H, W), dtype=jnp.float32)

    out = spp_layer(x, num_levels)
    out = jax.block_until_ready(out)

    ref = _spp_reference(x, num_levels)
    assert out.shape == (N, C * (1 + 4 + 9)), out.shape
    assert jnp.allclose(out, ref, atol=1e-6, rtol=1e-6), "mismatch vs reference"

    print("KERNEL_OK")
</pallas_src>

<mosaic_0001>
module attributes {stable_mosaic.version = 11 : i64} {
  func.func @kernel(%arg0: i32, %arg1: memref<2x4x16x16xf32, #tpu.memory_space<vmem>>, %arg2: memref<2x14x4xf32, #tpu.memory_space<vmem>>) attributes {dimension_semantics = [#tpu.dimension_semantics<parallel>], iteration_bounds = array<i64: 1>, scalar_prefetch = 0 : i64, scratch_operands = 0 : i64, tpu.core_type = #tpu.core_type<tc>, window_params = [{transform_indices = @transform_0, window_bounds = array<i64: 2, 4, 16, 16>}, {transform_indices = @transform_1, window_bounds = array<i64: 2, 14, 4>}]} {
    %c0 = arith.constant 0 : index
    %c0_0 = arith.constant 0 : index
    %c0_1 = arith.constant 0 : index
    %c0_2 = arith.constant 0 : index
    %0 = vector.load %arg1[%c0, %c0_0, %c0_1, %c0_2] : memref<2x4x16x16xf32, #tpu.memory_space<vmem>>, vector<2x4x6x16xf32>
    %cst = arith.constant dense<0xFF800000> : vector<2x4x16xf32>
    %1 = vector.multi_reduction <maximumf>, %0, %cst [2] : vector<2x4x6x16xf32> to vector<2x4x16xf32>
    %2 = vector.extract_strided_slice %1 {offsets = [0, 0, 0], sizes = [2, 4, 6], strides = [1, 1, 1]} : vector<2x4x16xf32> to vector<2x4x6xf32>
    %cst_3 = arith.constant dense<0xFF800000> : vector<2x4xf32>
    %3 = vector.multi_reduction <maximumf>, %2, %cst_3 [2] : vector<2x4x6xf32> to vector<2x4xf32>
    %4 = vector.shape_cast %3 : vector<2x4xf32> to vector<2x1x4xf32>
    %c0_4 = arith.constant 0 : index
    %c5 = arith.constant 5 : index
    %c0_5 = arith.constant 0 : index
    %5 = vector.load %arg2[%c0_4, %c5, %c0_5] : memref<2x14x4xf32, #tpu.memory_space<vmem>>, vector<2x1x4xf32>
    tpu.vector_store %arg2[%c0_4, %c5, %c0_5], %4 {strides = array<i32>} : memref<2x14x4xf32, #tpu.memory_space<vmem>>, vector<2x1x4xf32>,
    %6 = vector.extract_strided_slice %1 {offsets = [0, 0, 5], sizes = [2, 4, 6], strides = [1, 1, 1]} : vector<2x4x16xf32> to vector<2x4x6xf32>
    %cst_6 = arith.constant dense<0xFF800000> : vector<2x4xf32>
    %7 = vector.multi_reduction <maximumf>, %6, %cst_6 [2] : vector<2x4x6xf32> to vector<2x4xf32>
    %8 = vector.shape_cast %7 : vector<2x4xf32> to vector<2x1x4xf32>
    %c0_7 = arith.constant 0 : index
    %c6 = arith.constant 6 : index
    %c0_8 = arith.constant 0 : index
    %9 = vector.load %arg2[%c0_7, %c6, %c0_8] : memref<2x14x4xf32, #tpu.memory_space<vmem>>, vector<2x1x4xf32>
    tpu.vector_store %arg2[%c0_7, %c6, %c0_8], %8 {strides = array<i32>} : memref<2x14x4xf32, #tpu.memory_space<vmem>>, vector<2x1x4xf32>,
    %10 = vector.extract_strided_slice %1 {offsets = [0, 0, 10], sizes = [2, 4, 6], strides = [1, 1, 1]} : vector<2x4x16xf32> to vector<2x4x6xf32>
    %cst_9 = arith.constant dense<0xFF800000> : vector<2x4xf32>
    %11 = vector.multi_reduction <maximumf>, %10, %cst_9 [2] : vector<2x4x6xf32> to vector<2x4xf32>
    %12 = vector.shape_cast %11 : vector<2x4xf32> to vector<2x1x4xf32>
    %c0_10 = arith.constant 0 : index
    %c7 = arith.constant 7 : index
    %c0_11 = arith.constant 0 : index
    %13 = vector.load %arg2[%c0_10, %c7, %c0_11] : memref<2x14x4xf32, #tpu.memory_space<vmem>>, vector<2x1x4xf32>
    tpu.vector_store %arg2[%c0_10, %c7, %c0_11], %12 {strides = array<i32>} : memref<2x14x4xf32, #tpu.memory_space<vmem>>, vector<2x1x4xf32>,
    %c0_12 = arith.constant 0 : index
    %c0_13 = arith.constant 0 : index
    %c5_14 = arith.constant 5 : index
    %c0_15 = arith.constant 0 : index
    %14 = vector.load %arg1[%c0_12, %c0_13, %c5_14, %c0_15] : memref<2x4x16x16xf32, #tpu.memory_space<vmem>>, vector<2x4x6x16xf32>
    %cst_16 = arith.constant dense<0xFF800000> : vector<2x4x16xf32>
    %15 = vector.multi_reduction <maximumf>, %14, %cst_16 [2] : vector<2x4x6x16xf32> to vector<2x4x16xf32>
    %16 = vector.extract_strided_slice %15 {offsets = [0, 0, 0], sizes = [2, 4, 6], strides = [1, 1, 1]} : vector<2x4x16xf32> to vector<2x4x6xf32>
    %cst_17 = arith.constant dense<0xFF800000> : vector<2x4xf32>
    %17 = vector.multi_reduction <maximumf>, %16, %cst_17 [2] : vector<2x4x6xf32> to vector<2x4xf32>
    %18 = vector.shape_cast %17 : vector<2x4xf32> to vector<2x1x4xf32>
    %c0_18 = arith.constant 0 : index
    %c8 = arith.constant 8 : index
    %c0_19 = arith.constant 0 : index
    %19 = vector.load %arg2[%c0_18, %c8, %c0_19] : memref<2x14x4xf32, #tpu.memory_space<vmem>>, vector<2x1x4xf32>
    tpu.vector_store %arg2[%c0_18, %c8, %c0_19], %18 {strides = array<i32>} : memref<2x14x4xf32, #tpu.memory_space<vmem>>, vector<2x1x4xf32>,
    %20 = vector.extract_strided_slice %15 {offsets = [0, 0, 5], sizes = [2, 4, 6], strides = [1, 1, 1]} : vector<2x4x16xf32> to vector<2x4x6xf32>
    %cst_20 = arith.constant dense<0xFF800000> : vector<2x4xf32>
    %21 = vector.multi_reduction <maximumf>, %20, %cst_20 [2] : vector<2x4x6xf32> to vector<2x4xf32>
    %22 = vector.shape_cast %21 : vector<2x4xf32> to vector<2x1x4xf32>
    %c0_21 = arith.constant 0 : index
    %c9 = arith.constant 9 : index
    %c0_22 = arith.constant 0 : index
    %23 = vector.load %arg2[%c0_21, %c9, %c0_22] : memref<2x14x4xf32, #tpu.memory_space<vmem>>, vector<2x1x4xf32>
    tpu.vector_store %arg2[%c0_21, %c9, %c0_22], %22 {strides = array<i32>} : memref<2x14x4xf32, #tpu.memory_space<vmem>>, vector<2x1x4xf32>,
    %24 = vector.extract_strided_slice %15 {offsets = [0, 0, 10], sizes = [2, 4, 6], strides = [1, 1, 1]} : vector<2x4x16xf32> to vector<2x4x6xf32>
    %cst_23 = arith.constant dense<0xFF800000> : vector<2x4xf32>
    %25 = vector.multi_reduction <maximumf>, %24, %cst_23 [2] : vector<2x4x6xf32> to vector<2x4xf32>
    %26 = vector.shape_cast %25 : vector<2x4xf32> to vector<2x1x4xf32>
    %c0_24 = arith.constant 0 : index
    %c10 = arith.constant 10 : index
    %c0_25 = arith.constant 0 : index
    %27 = vector.load %arg2[%c0_24, %c10, %c0_25] : memref<2x14x4xf32, #tpu.memory_space<vmem>>, vector<2x1x4xf32>
    tpu.vector_store %arg2[%c0_24, %c10, %c0_25], %26 {strides = array<i32>} : memref<2x14x4xf32, #tpu.memory_space<vmem>>, vector<2x1x4xf32>,
    %c0_26 = arith.constant 0 : index
    %c0_27 = arith.constant 0 : index
    %c10_28 = arith.constant 10 : index
    %c0_29 = arith.constant 0 : index
    %28 = vector.load %arg1[%c0_26, %c0_27, %c10_28, %c0_29] : memref<2x4x16x16xf32, #tpu.memory_space<vmem>>, vector<2x4x6x16xf32>
    %cst_30 = arith.constant dense<0xFF800000> : vector<2x4x16xf32>
    %29 = vector.multi_reduction <maximumf>, %28, %cst_30 [2] : vector<2x4x6x16xf32> to vector<2x4x16xf32>
    %30 = vector.extract_strided_slice %29 {offsets = [0, 0, 0], sizes = [2, 4, 6], strides = [1, 1, 1]} : vector<2x4x16xf32> to vector<2x4x6xf32>
    %cst_31 = arith.constant dense<0xFF800000> : vector<2x4xf32>
    %31 = vector.multi_reduction <maximumf>, %30, %cst_31 [2] : vector<2x4x6xf32> to vector<2x4xf32>
    %32 = vector.shape_cast %31 : vector<2x4xf32> to vector<2x1x4xf32>
    %c0_32 = arith.constant 0 : index
    %c11 = arith.constant 11 : index
    %c0_33 = arith.constant 0 : index
    %33 = vector.load %arg2[%c0_32, %c11, %c0_33] : memref<2x14x4xf32, #tpu.memory_space<vmem>>, vector<2x1x4xf32>
    tpu.vector_store %arg2[%c0_32, %c11, %c0_33], %32 {strides = array<i32>} : memref<2x14x4xf32, #tpu.memory_space<vmem>>, vector<2x1x4xf32>,
    %34 = vector.extract_strided_slice %29 {offsets = [0, 0, 5], sizes = [2, 4, 6], strides = [1, 1, 1]} : vector<2x4x16xf32> to vector<2x4x6xf32>
    %cst_34 = arith.constant dense<0xFF800000> : vector<2x4xf32>
    %35 = vector.multi_reduction <maximumf>, %34, %cst_34 [2] : vector<2x4x6xf32> to vector<2x4xf32>
    %36 = vector.shape_cast %35 : vector<2x4xf32> to vector<2x1x4xf32>
    %c0_35 = arith.constant 0 : index
    %c12 = arith.constant 12 : index
    %c0_36 = arith.constant 0 : index
    %37 = vector.load %arg2[%c0_35, %c12, %c0_36] : memref<2x14x4xf32, #tpu.memory_space<vmem>>, vector<2x1x4xf32>
    tpu.vector_store %arg2[%c0_35, %c12, %c0_36], %36 {strides = array<i32>} : memref<2x14x4xf32, #tpu.memory_space<vmem>>, vector<2x1x4xf32>,
    %38 = vector.extract_strided_slice %29 {offsets = [0, 0, 10], sizes = [2, 4, 6], strides = [1, 1, 1]} : vector<2x4x16xf32> to vector<2x4x6xf32>
    %cst_37 = arith.constant dense<0xFF800000> : vector<2x4xf32>
    %39 = vector.multi_reduction <maximumf>, %38, %cst_37 [2] : vector<2x4x6xf32> to vector<2x4xf32>
    %40 = vector.shape_cast %39 : vector<2x4xf32> to vector<2x1x4xf32>
    %c0_38 = arith.constant 0 : index
    %c13 = arith.constant 13 : index
    %c0_39 = arith.constant 0 : index
    %41 = vector.load %arg2[%c0_38, %c13, %c0_39] : memref<2x14x4xf32, #tpu.memory_space<vmem>>, vector<2x1x4xf32>
    tpu.vector_store %arg2[%c0_38, %c13, %c0_39], %40 {strides = array<i32>} : memref<2x14x4xf32, #tpu.memory_space<vmem>>, vector<2x1x4xf32>,
    %c0_40 = arith.constant 0 : index
    %c0_41 = arith.constant 0 : index
    %c0_42 = arith.constant 0 : index
    %c0_43 = arith.constant 0 : index
    %42 = vector.load %arg1[%c0_40, %c0_41, %c0_42, %c0_43] : memref<2x4x16x16xf32, #tpu.memory_space<vmem>>, vector<2x4x8x16xf32>
    %cst_44 = arith.constant dense<0xFF800000> : vector<2x4x16xf32>
    %43 = vector.multi_reduction <maximumf>, %42, %cst_44 [2] : vector<2x4x8x16xf32> to vector<2x4x16xf32>
    %44 = vector.extract_strided_slice %43 {offsets = [0, 0, 0], sizes = [2, 4, 8], strides = [1, 1, 1]} : vector<2x4x16xf32> to vector<2x4x8xf32>
    %cst_45 = arith.constant dense<0xFF800000> : vector<2x4xf32>
    %45 = vector.multi_reduction <maximumf>, %44, %cst_45 [2] : vector<2x4x8xf32> to vector<2x4xf32>
    %46 = vector.shape_cast %45 : vector<2x4xf32> to vector<2x1x4xf32>
    %c0_46 = arith.constant 0 : index
    %c1 = arith.constant 1 : index
    %c0_47 = arith.constant 0 : index
    %47 = vector.load %arg2[%c0_46, %c1, %c0_47] : memref<2x14x4xf32, #tpu.memory_space<vmem>>, vector<2x1x4xf32>
    tpu.vector_store %arg2[%c0_46, %c1, %c0_47], %46 {strides = array<i32>} : memref<2x14x4xf32, #tpu.memory_space<vmem>>, vector<2x1x4xf32>,
    %48 = vector.extract_strided_slice %43 {offsets = [0, 0, 8], sizes = [2, 4, 8], strides = [1, 1, 1]} : vector<2x4x16xf32> to vector<2x4x8xf32>
    %cst_48 = arith.constant dense<0xFF800000> : vector<2x4xf32>
    %49 = vector.multi_reduction <maximumf>, %48, %cst_48 [2] : vector<2x4x8xf32> to vector<2x4xf32>
    %50 = vector.shape_cast %49 : vector<2x4xf32> to vector<2x1x4xf32>
    %c0_49 = arith.constant 0 : index
    %c2 = arith.constant 2 : index
    %c0_50 = arith.constant 0 : index
    %51 = vector.load %arg2[%c0_49, %c2, %c0_50] : memref<2x14x4xf32, #tpu.memory_space<vmem>>, vector<2x1x4xf32>
    tpu.vector_store %arg2[%c0_49, %c2, %c0_50], %50 {strides = array<i32>} : memref<2x14x4xf32, #tpu.memory_space<vmem>>, vector<2x1x4xf32>,
    %c0_51 = arith.constant 0 : index
    %c0_52 = arith.constant 0 : index
    %c8_53 = arith.constant 8 : index
    %c0_54 = arith.constant 0 : index
    %52 = vector.load %arg1[%c0_51, %c0_52, %c8_53, %c0_54] : memref<2x4x16x16xf32, #tpu.memory_space<vmem>>, vector<2x4x8x16xf32>
    %cst_55 = arith.constant dense<0xFF800000> : vector<2x4x16xf32>
    %53 = vector.multi_reduction <maximumf>, %52, %cst_55 [2] : vector<2x4x8x16xf32> to vector<2x4x16xf32>
    %54 = vector.extract_strided_slice %53 {offsets = [0, 0, 0], sizes = [2, 4, 8], strides = [1, 1, 1]} : vector<2x4x16xf32> to vector<2x4x8xf32>
    %cst_56 = arith.constant dense<0xFF800000> : vector<2x4xf32>
    %55 = vector.multi_reduction <maximumf>, %54, %cst_56 [2] : vector<2x4x8xf32> to vector<2x4xf32>
    %56 = vector.shape_cast %55 : vector<2x4xf32> to vector<2x1x4xf32>
    %c0_57 = arith.constant 0 : index
    %c3 = arith.constant 3 : index
    %c0_58 = arith.constant 0 : index
    %57 = vector.load %arg2[%c0_57, %c3, %c0_58] : memref<2x14x4xf32, #tpu.memory_space<vmem>>, vector<2x1x4xf32>
    tpu.vector_store %arg2[%c0_57, %c3, %c0_58], %56 {strides = array<i32>} : memref<2x14x4xf32, #tpu.memory_space<vmem>>, vector<2x1x4xf32>,
    %58 = vector.extract_strided_slice %53 {offsets = [0, 0, 8], sizes = [2, 4, 8], strides = [1, 1, 1]} : vector<2x4x16xf32> to vector<2x4x8xf32>
    %cst_59 = arith.constant dense<0xFF800000> : vector<2x4xf32>
    %59 = vector.multi_reduction <maximumf>, %58, %cst_59 [2] : vector<2x4x8xf32> to vector<2x4xf32>
    %60 = vector.shape_cast %59 : vector<2x4xf32> to vector<2x1x4xf32>
    %c0_60 = arith.constant 0 : index
    %c4 = arith.constant 4 : index
    %c0_61 = arith.constant 0 : index
    %61 = vector.load %arg2[%c0_60, %c4, %c0_61] : memref<2x14x4xf32, #tpu.memory_space<vmem>>, vector<2x1x4xf32>
    tpu.vector_store %arg2[%c0_60, %c4, %c0_61], %60 {strides = array<i32>} : memref<2x14x4xf32, #tpu.memory_space<vmem>>, vector<2x1x4xf32>,
    %62 = arith.maximumf %4, %8 : vector<2x1x4xf32>
    %63 = arith.maximumf %62, %12 : vector<2x1x4xf32>
    %64 = arith.maximumf %63, %18 : vector<2x1x4xf32>
    %65 = arith.maximumf %64, %22 : vector<2x1x4xf32>
    %66 = arith.maximumf %65, %26 : vector<2x1x4xf32>
    %67 = arith.maximumf %66, %32 : vector<2x1x4xf32>
    %68 = arith.maximumf %67, %36 : vector<2x1x4xf32>
    %69 = arith.maximumf %68, %40 : vector<2x1x4xf32>
    %c0_62 = arith.constant 0 : index
    %c0_63 = arith.constant 0 : index
    %c0_64 = arith.constant 0 : index
    %70 = vector.load %arg2[%c0_62, %c0_63, %c0_64] : memref<2x14x4xf32, #tpu.memory_space<vmem>>, vector<2x1x4xf32>
    tpu.vector_store %arg2[%c0_62, %c0_63, %c0_64], %69 {strides = array<i32>} : memref<2x14x4xf32, #tpu.memory_space<vmem>>, vector<2x1x4xf32>,
    return
  }
  func.func @transform_0(%arg0: i32) -> (i32, i32, i32, i32) {
    %c0_i32 = arith.constant 0 : i32
    %c0_i32_0 = arith.constant 0 : i32
    %c0_i32_1 = arith.constant 0 : i32
    %c0_i32_2 = arith.constant 0 : i32
    return %arg0, %c0_i32, %c0_i32_0, %c0_i32_1 : i32, i32, i32, i32
  }
  func.func @transform_1(%arg0: i32) -> (i32, i32, i32) {
    %c0_i32 = arith.constant 0 : i32
    %c0_i32_0 = arith.constant 0 : i32
    %c0_i32_1 = arith.constant 0 : i32
    return %arg0, %c0_i32, %c0_i32_0 : i32, i32, i32
  }
}

</mosaic_0001>

<bundles_post_ra>
// kernel: tpu_custom_call.1
= control target key start
LH: loop header
LB: loop body
LE: loop exit
PB: predicated region body
PF: predicated region fallthrough
CT: control target
= control target key end

     0   :  { %6 = vsyncpa [#allocation3], 0  ;;  %s993_s0 = inlined_call_operand.hbm [shape: f32[2,4,16,16], index: 0, kind: input, shape index: {}]   ;;  %s994_s1 = inlined_call_operand.hbm [shape: f32[2,14,4], index: 1, kind: output, shape index: {}]  }
   0x1   :  { %7 = vsyncpa [#allocation4], 0  ;;  %s795_s6 = smov [#allocation2]   ;;  %s747_s10 = scalar_lea.hbm %s993_s0, 2048 }
   0x2   :  { %s13_s7 = sshll.u32 %s795_s6, 4  ;;  %p748_p0 = scmp.ne.s32.totalorder %s993_s0, %s747_s10  ;;  %s14_s7 = int_to_ptr.vmem [resolvable:$true] %s13_s7 }
   0x3   :  { %p751_p1 = scmp.lt.u32.totalorder %s747_s10, %s993_s0 }
   0x5   :  { %p753_p2 = pnand %p751_p1, %p748_p0 }
   0x7   :  { %756 = shalt.err (!%p753_p2)
}
   0x8   :  { %s757_s15 = scalar_lea.vmem %s14_s7, 2048  ;;  %p762_p4 = scmp.lt.s32.totalorder %s14_s7, %s14_s7 }
   0x9   :  { %p758_p3 = scmp.ne.s32.totalorder %s14_s7, %s757_s15  ;;  %p763_p5 = scmp.lt.s32.totalorder %s757_s15, %s757_s15 }
   0xb   :  { %p764_p6 = por %p763_p5, %p762_p4 }
   0xd   :  { %p765_p7 = pnand %p764_p6, %p758_p3 }
   0xf   :  { %768 = shalt.err (!%p765_p7)
}
  0x10   :  { %s796_s16 = smov 128   ;;  %s797_s17 = smov 8  }
  0x11   :  { %19 = dma.hbm_to_vmem [thread:$0]  %s993_s0, 2048, %s14_s7, [#allocation3], %s796_s16, %s796_s16, %s797_s17  }
  0x12   :  { %791 = dma.done.wait [#allocation3], 2048  }
  0x13   :  { %792 = vsyncadd [#allocation3], 4294965248  ;;  %vm31_vm0 = vcmask 128000   ;;  %v23_v0 = vld [vmem:[#allocation2] sm:$0x3f]  ;;  %vm96_vm1 = vcmask 1041409  }
  0x14   :  { %v24_v1 = vld [vmem:[#allocation2 + $0x10] sm:$0x3f]  ;;  %v25_v2 = vld [vmem:[#allocation2 + $0x20] sm:$0x3f]  ;;  %v32_v4 = vsel %vm31_vm0, %v23_v0, -inf  ;;  %vm98_vm2 = vcmask 1042434  }
  0x15   :  { %v26_v3 = vld [vmem:[#allocation2 + $0x30] sm:$0x3f]  ;;  %v39_v5 = vsel %vm31_vm0, %v24_v1, -inf  ;;  %v46_v6 = vsel %vm31_vm0, %v25_v2, -inf  ;;  %v33_v7 = vrot.slane %v32_v4, 4  ;;  %vm100_vm3 = vcmask 1043459  }
  0x16   :  { %v40_v8 = vrot.slane %v39_v5, 4  ;;  %v47_v9 = vrot.slane %v46_v6, 4  ;;  %v53_v10 = vsel %vm31_vm0, %v26_v3, -inf  ;;  %v27_v11 = vld [vmem:[#allocation2 + $0x40] sm:$0x3f]  ;;  %vm131_vm4 = vcmask 85032  }
  0x17   :  { %v54_v12 = vrot.slane %v53_v10, 4  ;;  %v28_v13 = vld [vmem:[#allocation2 + $0x50] sm:$0x3f]  ;;  %v29_v14 = vld [vmem:[#allocation2 + $0x60] sm:$0x3f]  ;;  %v60_v15 = vsel %vm31_vm0, %v27_v11, -inf  ;;  %v34_v16 = vmax.f32 %v32_v4, %v33_v7 }
  0x18   :  { %v41_v17 = vmax.f32 %v39_v5, %v40_v8  ;;  %v48_v18 = vmax.f32 %v46_v6, %v47_v9  ;;  %v30_v19 = vld [vmem:[#allocation2 + $0x70] sm:$0x3f]  ;;  %v61_v20 = vrot.slane %v60_v15, 4  ;;  %v67_v22 = vsel %vm31_vm0, %v28_v13, -inf  ;;  %v177_v45 = vld [vmem:[#allocation2 + $0x45] sm:$0x3f] }
  0x19   :  { %v55_v21 = vmax.f32 %v53_v10, %v54_v12  ;;  %v74_v23 = vsel %vm31_vm0, %v29_v14, -inf  ;;  %v81_v24 = vsel %vm31_vm0, %v30_v19, -inf  ;;  %v35_v25 = vrot.slane %v34_v16, 2  ;;  %v178_v50 = vld [vmem:[#allocation2 + $0x55] sm:$0x3f]  ;;  %s798_s0 = smov [#allocation5]  }
  0x1a   :  { %v42_v26 = vrot.slane %v41_v17, 2  ;;  %v49_v27 = vrot.slane %v48_v18, 2  ;;  %vm107_vm5 = vcmask 44032   ;;  %v62_v28 = vmax.f32 %v60_v15, %v61_v20  ;;  %v179_v59 = vld [vmem:[#allocation2 + $0x65] sm:$0x3f]  ;;  %s731_s20 = sshll.u32 %s798_s0, 4  ;;  %s732_s20 = int_to_ptr.vmem [resolvable:$true] %s731_s20 }
  0x1b   :  { %v56_v29 = vrot.slane %v55_v21, 2  ;;  %v68_v30 = vrot.slane %v67_v22, 4  ;;  %v75_v31 = vrot.slane %v74_v23, 4  ;;  %v82_v32 = vrot.slane %v81_v24, 4  ;;  %v180_v4 = vld [vmem:[#allocation2 + $0x75] sm:$0x3f]  ;;  %p774_p9 = scmp.lt.s32.totalorder %s732_s20, %s732_s20 }
  0x1c   :  { %vm152_vm6 = vcmask 126032   ;;  %v36_v33 = vmax.f32 %v34_v16, %v35_v25  ;;  %v43_v34 = vmax.f32 %v41_v17, %v42_v26  ;;  %v50_v35 = vmax.f32 %v48_v18, %v49_v27  ;;  %v173_v9 = vld [vmem:[#allocation2 + $0x5] sm:$0x3f]  ;;  %v174_v18 = vld [vmem:[#allocation2 + $0x15] sm:$0x3f]  ;;  %s769_s21 = scalar_lea.vmem %s732_s20, 512 }
  0x1d   :  { %v63_v36 = vrot.slane %v62_v28, 2  ;;  %v57_v37 = vmax.f32 %v55_v21, %v56_v29  ;;  %v69_v38 = vmax.f32 %v67_v22, %v68_v30  ;;  %v76_v39 = vmax.f32 %v74_v23, %v75_v31  ;;  %v175_v29 = vld [vmem:[#allocation2 + $0x25] sm:$0x3f]  ;;  %v176_v30 = vld [vmem:[#allocation2 + $0x35] sm:$0x3f]  ;;  %p770_p8 = scmp.ne.s32.totalorder %s732_s20, %s769_s21  ;;  %p775_p10 = scmp.lt.s32.totalorder %s769_s21, %s769_s21 }
  0x1e   :  { %v83_v40 = vmax.f32 %v81_v24, %v82_v32  ;;  %v37_v41 = vrot.slane %v36_v33, 1  ;;  %v44_v42 = vrot.slane %v43_v34, 1  ;;  %v51_v43 = vrot.slane %v50_v35, 1 }
  0x1f   :  { %v64_v44 = vmax.f32 %v62_v28, %v63_v36  ;;  %v58_v46 = vrot.slane %v57_v37, 1  ;;  %v70_v47 = vrot.slane %v69_v38, 2  ;;  %v77_v48 = vrot.slane %v76_v39, 2  ;;  %p776_p11 = por %p775_p10, %p774_p9 }
  0x20   :  { %v84_v49 = vrot.slane %v83_v40, 2  ;;  %v38_v51 = vmax.f32 %v36_v33, %v37_v41  ;;  %v45_v52 = vmax.f32 %v43_v34, %v44_v42  ;;  %v52_v53 = vmax.f32 %v50_v35, %v51_v43 }
  0x21   :  { %v65_v54 = vrot.slane %v64_v44, 1  ;;  %v59_v55 = vmax.f32 %v57_v37, %v58_v46  ;;  %v71_v56 = vmax.f32 %v69_v38, %v70_v47  ;;  %v78_v57 = vmax.f32 %v76_v39, %v77_v48  ;;  %p777_p12 = pnand %p776_p11, %p770_p8 }
  0x22   :  { %v85_v58 = vmax.f32 %v83_v40, %v84_v49  ;;  %v97_v60 = vsel %vm96_vm1, %v45_v52, %v38_v51  ;;  %v209_v62 = vsel %vm31_vm0, %v177_v45, -inf  ;;  %v216_v63 = vsel %vm31_vm0, %v178_v50, -inf  ;;  %v317_v49 = vld [vmem:[#allocation2 + $0x4a] sm:$0x3f] }
  0x23   :  { %v66_v61 = vmax.f32 %v64_v44, %v65_v54  ;;  %v99_v0 = vsel %vm98_vm2, %v52_v53, %v97_v60  ;;  %v72_v1 = vrot.slane %v71_v56, 1  ;;  %v79_v2 = vrot.slane %v78_v57, 1 }
  0x24   :  { %v86_v3 = vrot.slane %v85_v58, 1  ;;  %v101_v5 = vsel %vm100_vm3, %v59_v55, %v99_v0  ;;  %v210_v6 = vrot.slane %v209_v62, 4  ;;  %v217_v7 = vrot.slane %v216_v63, 4 }
  0x25   :  { %v223_v8 = vsel %vm31_vm0, %v179_v59, -inf  ;;  %v132_v10 = vsel %vm131_vm4, %v101_v5, -inf  ;;  %v108_v11 = vsel %vm107_vm5, %v101_v5, -inf  ;;  %v73_v12 = vmax.f32 %v71_v56, %v72_v1 }
  0x26   :  { %v80_v13 = vmax.f32 %v78_v57, %v79_v2  ;;  %133 = vmax.xlane.f32.xlu1 %v132_v10  ;;  %109 = vmax.xlane.f32.xlu0 %v108_v11  ;;  %v87_v14 = vmax.f32 %v85_v58, %v86_v3  ;;  %v153_v15 = vsel %vm152_vm6, %v101_v5, -inf  ;;  %v211_v16 = vmax.f32 %v209_v62, %v210_v6  ;;  %v319_v3 = vld [vmem:[#allocation2 + $0x6a] sm:$0x3f] }
  0x27   :  { %v218_v17 = vmax.f32 %v216_v63, %v217_v7  ;;  %v102_v19 = vsel %vm96_vm1, %v73_v12, %v66_v61  ;;  %v224_v20 = vrot.slane %v223_v8, 4  ;;  %v230_v21 = vsel %vm31_vm0, %v180_v4, -inf  ;;  %v318_v61 = vld [vmem:[#allocation2 + $0x5a] sm:$0x3f] }
  0x28   :  { %v181_v22 = vsel %vm31_vm0, %v173_v9, -inf  ;;  %v103_v23 = vsel %vm98_vm2, %v80_v13, %v102_v19  ;;  %v212_v24 = vrot.slane %v211_v16, 2  ;;  %v231_v26 = vrot.slane %v230_v21, 4  ;;  %v320_v7 = vld [vmem:[#allocation2 + $0x7a] sm:$0x3f] }
  0x29   :  { %v219_v25 = vrot.slane %v218_v17, 2  ;;  %v104_v27 = vsel %vm100_vm3, %v87_v14, %v103_v23  ;;  %v225_v28 = vmax.f32 %v223_v8, %v224_v20  ;;  %v182_v31 = vrot.slane %v181_v22, 4 }
  0x2a   :  { %v188_v32 = vsel %vm31_vm0, %v174_v18, -inf  ;;  %v135_v33 = vsel %vm131_vm4, %v104_v27, -inf  ;;  %v111_v34 = vsel %vm107_vm5, %v104_v27, -inf  ;;  %v156_v35 = vsel %vm152_vm6, %v104_v27, -inf }
  0x2b   :  { %v213_v36 = vmax.f32 %v211_v16, %v212_v24  ;;  %136 = vmax.xlane.f32.xlu1 %v135_v33  ;;  %112 = vmax.xlane.f32.xlu0 %v111_v34  ;;  %v220_v37 = vmax.f32 %v218_v17, %v219_v25  ;;  %v226_v38 = vrot.slane %v225_v28, 2  ;;  %v232_v39 = vmax.f32 %v230_v21, %v231_v26  ;;  %v313_v25 = vld [vmem:[#allocation2 + $0xa] sm:$0x3f] }
  0x2c   :  { %v183_v40 = vmax.f32 %v181_v22, %v182_v31  ;;  %v189_v42 = vrot.slane %v188_v32, 4  ;;  %v195_v43 = vsel %vm31_vm0, %v175_v29, -inf  ;;  %v202_v44 = vsel %vm31_vm0, %v176_v30, -inf  ;;  %v314_v30 = vld [vmem:[#allocation2 + $0x1a] sm:$0x3f] }
  0x2d   :  { %v214_v41 = vrot.slane %v213_v36, 1  ;;  %v221_v45 = vrot.slane %v220_v37, 1  ;;  %v227_v46 = vmax.f32 %v225_v28, %v226_v38  ;;  %v233_v47 = vrot.slane %v232_v39, 2 }
  0x2e   :  { %v184_v48 = vrot.slane %v183_v40, 2  ;;  %v190_v51 = vmax.f32 %v188_v32, %v189_v42  ;;  %v196_v52 = vrot.slane %v195_v43, 4  ;;  %v203_v53 = vrot.slane %v202_v44, 4 }
  0x2f   :  { %v215_v50 = vmax.f32 %v213_v36, %v214_v41  ;;  %157 = vmax.xlane.f32.xlu1 %v156_v35  ;;  %154 = vmax.xlane.f32.xlu0 %v153_v15  ;;  %v222_v54 = vmax.f32 %v220_v37, %v221_v45  ;;  %v228_v55 = vrot.slane %v227_v46, 1  ;;  %v234_v56 = vmax.f32 %v232_v39, %v233_v47  ;;  %v315_v47 = vld [vmem:[#allocation2 + $0x2a] sm:$0x3f] }
  0x30   :  { %v185_v57 = vmax.f32 %v183_v40, %v184_v48  ;;  %v191_v58 = vrot.slane %v190_v51, 2  ;;  %v197_v59 = vmax.f32 %v195_v43, %v196_v52  ;;  %v204_v60 = vmax.f32 %v202_v44, %v203_v53  ;;  %v316_v48 = vld [vmem:[#allocation2 + $0x3a] sm:$0x3f] }
  0x31   :  { %v349_v62 = vsel %vm31_vm0, %v317_v49, -inf  ;;  %v229_v63 = vmax.f32 %v227_v46, %v228_v55  ;;  %v235_v0 = vrot.slane %v234_v56, 1  ;;  %v248_v1 = vsel %vm96_vm1, %v222_v54, %v215_v50 }
  0x32   :  { %v186_v2 = vrot.slane %v185_v57, 1  ;;  %v192_v4 = vmax.f32 %v190_v51, %v191_v58  ;;  %v198_v5 = vrot.slane %v197_v59, 2  ;;  %v205_v6 = vrot.slane %v204_v60, 2 }
  0x33   :  { %v350_v8 = vrot.slane %v349_v62, 4  ;;  %v236_v9 = vmax.f32 %v234_v56, %v235_v0  ;;  %v249_v10 = vsel %vm98_vm2, %v229_v63, %v248_v1  ;;  %v356_v12 = vsel %vm31_vm0, %v318_v61, -inf }
  0x34   :  { %v187_v11 = vmax.f32 %v185_v57, %v186_v2  ;;  %v193_v13 = vrot.slane %v192_v4, 1  ;;  %v199_v14 = vmax.f32 %v197_v59, %v198_v5  ;;  %v206_v15 = vmax.f32 %v204_v60, %v205_v6  ;;  %v457_v57 = vld [vmem:[#allocation2 + $0x40] sm:$0xff]  ;;  %v458_v5 = vld [vmem:[#allocation2 + $0x50] sm:$0xff] }
  0x35   :  { %v351_v16 = vmax.f32 %v349_v62, %v350_v8  ;;  %v250_v17 = vsel %vm100_vm3, %v236_v9, %v249_v10  ;;  %v357_v18 = vrot.slane %v356_v12, 4  ;;  %v363_v19 = vsel %vm31_vm0, %v319_v3, -inf }
  0x36   :  { %v370_v20 = vsel %vm31_vm0, %v320_v7, -inf  ;;  %vm461_vm7 = vcmask 130048   ;;  %v256_v21 = vsel %vm107_vm5, %v250_v17, -inf  ;;  %v194_v22 = vmax.f32 %v192_v4, %v193_v13 }
  0x37   :  { %v200_v23 = vrot.slane %v199_v14, 1  ;;  %v207_v24 = vrot.slane %v206_v15, 1  ;;  %257 = vmax.xlane.f32.xlu1 %v256_v21  ;;  %v276_v26 = vsel %vm131_vm4, %v250_v17, -inf  ;;  %v296_v27 = vsel %vm152_vm6, %v250_v17, -inf }
  0x38   :  { %v352_v28 = vrot.slane %v351_v16, 2  ;;  %v358_v29 = vmax.f32 %v356_v12, %v357_v18  ;;  %v245_v33 = vsel %vm96_vm1, %v194_v22, %v187_v11  ;;  %v364_v34 = vrot.slane %v363_v19, 4 }
  0x39   :  { %v201_v31 = vmax.f32 %v199_v14, %v200_v23  ;;  %v208_v32 = vmax.f32 %v206_v15, %v207_v24  ;;  %v371_v37 = vrot.slane %v370_v20, 4  ;;  %v321_v38 = vsel %vm31_vm0, %v313_v25, -inf }
  0x3a   :  { %v353_v35 = vmax.f32 %v351_v16, %v352_v28  ;;  %v359_v36 = vrot.slane %v358_v29, 2  ;;  %v365_v40 = vmax.f32 %v363_v19, %v364_v34  ;;  %v322_v41 = vrot.slane %v321_v38, 4 }
  0x3b   :  { %v246_v39 = vsel %vm98_vm2, %v201_v31, %v245_v33  ;;  %v328_v42 = vsel %vm31_vm0, %v314_v30, -inf  ;;  %277 = vmax.xlane.f32.xlu1 %v276_v26  ;;  %v372_v46 = vmax.f32 %v370_v20, %v371_v37  ;;  %v335_v60 = vsel %vm31_vm0, %v315_v47, -inf  ;;  %v459_v26 = vld [vmem:[#allocation2 + $0x60] sm:$0xff] }
  0x3c   :  { %v247_v43 = vsel %vm100_vm3, %v208_v32, %v246_v39  ;;  %v354_v44 = vrot.slane %v353_v35, 1  ;;  %v360_v45 = vmax.f32 %v358_v29, %v359_v36  ;;  %v366_v52 = vrot.slane %v365_v40, 2  ;;  %v453_v37 = vld [vmem:[#allocation2] sm:$0xff] }
  0x3d   :  { %v253_v49 = vsel %vm107_vm5, %v247_v43, -inf  ;;  %v273_v50 = vsel %vm131_vm4, %v247_v43, -inf  ;;  %v293_v51 = vsel %vm152_vm6, %v247_v43, -inf  ;;  %v373_v55 = vrot.slane %v372_v46, 2 }
  0x3e   :  { %254 = vmax.xlane.f32.xlu0 %v253_v49  ;;  %v355_v53 = vmax.f32 %v353_v35, %v354_v44  ;;  %v361_v54 = vrot.slane %v360_v45, 1  ;;  %v323_v56 = vmax.f32 %v321_v38, %v322_v41  ;;  %v367_v58 = vmax.f32 %v365_v40, %v366_v52 }
  0x3f   :  { %v329_v59 = vrot.slane %v328_v42, 4  ;;  %v342_v61 = vsel %vm31_vm0, %v316_v48, -inf  ;;  %297 = vmax.xlane.f32.xlu1 %v296_v27  ;;  %v374_v63 = vmax.f32 %v372_v46, %v373_v55  ;;  %v336_v1 = vrot.slane %v335_v60, 4  ;;  %v460_v27 = vld [vmem:[#allocation2 + $0x70] sm:$0xff] }
  0x40   :  { %v362_v62 = vmax.f32 %v360_v45, %v361_v54  ;;  %v324_v0 = vrot.slane %v323_v56, 2  ;;  %v368_v2 = vrot.slane %v367_v58, 1  ;;  %v343_v4 = vrot.slane %v342_v61, 4  ;;  %v454_v46 = vld [vmem:[#allocation2 + $0x10] sm:$0xff] }
  0x41   :  { %v330_v3 = vmax.f32 %v328_v42, %v329_v59  ;;  %v490_v6 = vsel %vm461_vm7, %v457_v57, -inf  ;;  %v375_v7 = vrot.slane %v374_v63, 1  ;;  %v337_v10 = vmax.f32 %v335_v60, %v336_v1  ;;  %v455_v57 = vld [vmem:[#allocation2 + $0x20] sm:$0xff] }
  0x42   :  { %274 = vmax.xlane.f32.xlu0 %v273_v50  ;;  %v388_v8 = vsel %vm96_vm1, %v362_v62, %v355_v53  ;;  %v325_v9 = vmax.f32 %v323_v56, %v324_v0  ;;  %v369_v11 = vmax.f32 %v367_v58, %v368_v2  ;;  %v344_v13 = vmax.f32 %v342_v61, %v343_v4  ;;  %v456_v58 = vld [vmem:[#allocation2 + $0x30] sm:$0xff]  ;;  %v580_v61 = vld [vmem:[#allocation2 + $0x48] sm:$0xff] }
  0x43   :  { %v331_v12 = vrot.slane %v330_v3, 2  ;;  %v491_v14 = vrot.slane %v490_v6, 4  ;;  %v376_v15 = vmax.f32 %v374_v63, %v375_v7  ;;  %v338_v17 = vrot.slane %v337_v10, 2 }
  0x44   :  { %v326_v16 = vrot.slane %v325_v9, 1  ;;  %v497_v18 = vsel %vm461_vm7, %v458_v5, -inf  ;;  %v389_v19 = vsel %vm98_vm2, %v369_v11, %v388_v8  ;;  %v345_v21 = vrot.slane %v344_v13, 2 }
  0x45   :  { %v332_v20 = vmax.f32 %v330_v3, %v331_v12  ;;  %v492_v22 = vmax.f32 %v490_v6, %v491_v14  ;;  %v390_v23 = vsel %vm100_vm3, %v376_v15, %v389_v19  ;;  %v339_v25 = vmax.f32 %v337_v10, %v338_v17  ;;  %v581_v17 = vld [vmem:[#allocation2 + $0x58] sm:$0xff] }
  0x46   :  { %294 = vmax.xlane.f32.xlu0 %v293_v51  ;;  %v327_v24 = vmax.f32 %v325_v9, %v326_v16  ;;  %v498_v28 = vrot.slane %v497_v18, 4  ;;  %v396_v29 = vsel %vm107_vm5, %v390_v23, -inf  ;;  %v346_v31 = vmax.f32 %v344_v13, %v345_v21 }
  0x47   :  { %v333_v30 = vrot.slane %v332_v20, 1  ;;  %v416_v32 = vsel %vm131_vm4, %v390_v23, -inf  ;;  %397 = vmax.xlane.f32.xlu1 %v396_v29  ;;  %v340_v33 = vrot.slane %v339_v25, 1  ;;  %v436_v34 = vsel %vm152_vm6, %v390_v23, -inf }
  0x48   :  { %v493_v35 = vrot.slane %v492_v22, 2  ;;  %v499_v36 = vmax.f32 %v497_v18, %v498_v28  ;;  %v347_v39 = vrot.slane %v346_v31, 1  ;;  %v504_v40 = vsel %vm461_vm7, %v459_v26, -inf  ;;  %v582_v26 = vld [vmem:[#allocation2 + $0x68] sm:$0xff] }
  0x49   :  { %v334_v38 = vmax.f32 %v332_v20, %v333_v30  ;;  %v511_v41 = vsel %vm461_vm7, %v460_v27, -inf  ;;  %v341_v42 = vmax.f32 %v339_v25, %v340_v33  ;;  %v505_v45 = vrot.slane %v504_v40, 4 }
  0x4a   :  { %v494_v43 = vmax.f32 %v492_v22, %v493_v35  ;;  %v500_v44 = vrot.slane %v499_v36, 2  ;;  %v348_v47 = vmax.f32 %v346_v31, %v347_v39  ;;  %v512_v49 = vrot.slane %v511_v41, 4 }
  0x4b   :  { %v385_v48 = vsel %vm96_vm1, %v334_v38, %v327_v24  ;;  %v462_v50 = vsel %vm461_vm7, %v453_v37, -inf  ;;  %417 = vmax.xlane.f32.xlu1 %v416_v32  ;;  %v506_v54 = vmax.f32 %v504_v40, %v505_v45  ;;  %v469_v60 = vsel %vm461_vm7, %v454_v46, -inf  ;;  %v576_v45 = vld [vmem:[#allocation2 + $0x8] sm:$0xff] }
  0x4c   :  { %v386_v51 = vsel %vm98_vm2, %v341_v42, %v385_v48  ;;  %v495_v52 = vrot.slane %v494_v43, 1  ;;  %v501_v53 = vmax.f32 %v499_v36, %v500_v44  ;;  %v513_v56 = vmax.f32 %v511_v41, %v512_v49  ;;  %v583_v44 = vld [vmem:[#allocation2 + $0x78] sm:$0xff] }
  0x4d   :  { %v387_v55 = vsel %vm100_vm3, %v348_v47, %v386_v51  ;;  %v463_v59 = vrot.slane %v462_v50, 4  ;;  %vm534_vm8 = vcmask 60416   ;;  %vm555_vm9 = vcmask 126016  }
  0x4e   :  { %v393_v62 = vsel %vm107_vm5, %v387_v55, -inf  ;;  %v413_v63 = vsel %vm131_vm4, %v387_v55, -inf  ;;  %v433_v0 = vsel %vm152_vm6, %v387_v55, -inf  ;;  %v496_v1 = vmax.f32 %v494_v43, %v495_v52 }
  0x4f   :  { %394 = vmax.xlane.f32.xlu0 %v393_v62  ;;  %v502_v2 = vrot.slane %v501_v53, 1  ;;  %v507_v3 = vrot.slane %v506_v54, 2  ;;  %v514_v4 = vrot.slane %v513_v56, 2  ;;  %v464_v5 = vmax.f32 %v462_v50, %v463_v59  ;;  %437 = vmax.xlane.f32.xlu1 %v436_v34 }
  0x50   :  { %v470_v6 = vrot.slane %v469_v60, 4  ;;  %v476_v7 = vsel %vm461_vm7, %v455_v57, -inf  ;;  %v483_v8 = vsel %vm461_vm7, %v456_v58, -inf  ;;  %v612_v9 = vsel %vm461_vm7, %v580_v61, -inf  ;;  %v577_v57 = vld [vmem:[#allocation2 + $0x18] sm:$0xff]  ;;  %v578_v58 = vld [vmem:[#allocation2 + $0x28] sm:$0xff] }
  0x51   :  { %v503_v10 = vmax.f32 %v501_v53, %v502_v2  ;;  %v508_v11 = vmax.f32 %v506_v54, %v507_v3  ;;  %v515_v12 = vmax.f32 %v513_v56, %v514_v4  ;;  %v465_v13 = vrot.slane %v464_v5, 2 }
  0x52   :  { %v471_v14 = vmax.f32 %v469_v60, %v470_v6  ;;  %v477_v15 = vrot.slane %v476_v7, 4  ;;  %v484_v16 = vrot.slane %v483_v8, 4  ;;  %v613_v18 = vrot.slane %v612_v9, 4 }
  0x53   :  { %414 = vmax.xlane.f32.xlu0 %v413_v63  ;;  %v509_v19 = vrot.slane %v508_v11, 1  ;;  %v516_v20 = vrot.slane %v515_v12, 1  ;;  %v529_v21 = vsel %vm96_vm1, %v503_v10, %v496_v1  ;;  %v466_v22 = vmax.f32 %v464_v5, %v465_v13 }
  0x54   :  { %v472_v23 = vrot.slane %v471_v14, 2  ;;  %v478_v24 = vmax.f32 %v476_v7, %v477_v15  ;;  %v485_v25 = vmax.f32 %v483_v8, %v484_v16  ;;  %v614_v27 = vmax.f32 %v612_v9, %v613_v18 }
  0x55   :  { %v510_v28 = vmax.f32 %v508_v11, %v509_v19  ;;  %v517_v29 = vmax.f32 %v515_v12, %v516_v20  ;;  %v467_v30 = vrot.slane %v466_v22, 1  ;;  %v619_v31 = vsel %vm461_vm7, %v581_v17, -inf  ;;  %v579_v11 = vld [vmem:[#allocation2 + $0x38] sm:$0xff] }
  0x56   :  { %v473_v32 = vmax.f32 %v471_v14, %v472_v23  ;;  %v479_v33 = vrot.slane %v478_v24, 2  ;;  %v486_v34 = vrot.slane %v485_v25, 2  ;;  %v615_v35 = vrot.slane %v614_v27, 2 }
  0x57   :  { %434 = vmax.xlane.f32.xlu0 %v433_v0  ;;  %v530_v36 = vsel %vm98_vm2, %v510_v28, %v529_v21  ;;  %v468_v37 = vmax.f32 %v466_v22, %v467_v30  ;;  %v620_v38 = vrot.slane %v619_v31, 4  ;;  %v626_v39 = vsel %vm461_vm7, %v582_v26, -inf }
  0x58   :  { %v531_v40 = vsel %vm100_vm3, %v517_v29, %v530_v36  ;;  %v474_v41 = vrot.slane %v473_v32, 1  ;;  %v480_v42 = vmax.f32 %v478_v24, %v479_v33  ;;  %v487_v43 = vmax.f32 %v485_v25, %v486_v34 }
  0x59   :  { %v538_v46 = vsel %vm534_vm8, %v531_v40, -inf  ;;  %v559_v47 = vsel %vm555_vm9, %v531_v40, -inf  ;;  %v616_v48 = vmax.f32 %v614_v27, %v615_v35  ;;  %v621_v49 = vmax.f32 %v619_v31, %v620_v38 }
  0x5a   :  { %539 = vmax.xlane.f32.xlu1 %v538_v46  ;;  %v475_v50 = vmax.f32 %v473_v32, %v474_v41  ;;  %v481_v51 = vrot.slane %v480_v42, 1  ;;  %v488_v52 = vrot.slane %v487_v43, 1  ;;  %v627_v53 = vrot.slane %v626_v39, 4 }
  0x5b   :  { %v617_v54 = vrot.slane %v616_v48, 1  ;;  %v622_v55 = vrot.slane %v621_v49, 2  ;;  %v633_v56 = vsel %vm461_vm7, %v583_v44, -inf  ;;  %v584_v59 = vsel %vm461_vm7, %v576_v45, -inf }
  0x5c   :  { %v482_v60 = vmax.f32 %v480_v42, %v481_v51  ;;  %v489_v61 = vmax.f32 %v487_v43, %v488_v52  ;;  %v526_v62 = vsel %vm96_vm1, %v475_v50, %v468_v37  ;;  %v628_v63 = vmax.f32 %v626_v39, %v627_v53 }
  0x5d   :  { %v618_v0 = vmax.f32 %v616_v48, %v617_v54  ;;  %v623_v1 = vmax.f32 %v621_v49, %v622_v55  ;;  %v634_v2 = vrot.slane %v633_v56, 4  ;;  %v585_v3 = vrot.slane %v584_v59, 4 }
  0x5e   :  { %v527_v4 = vsel %vm98_vm2, %v482_v60, %v526_v62  ;;  %560 = vmax.xlane.f32.xlu1 %v559_v47  ;;  %v629_v5 = vrot.slane %v628_v63, 2  ;;  %v591_v6 = vsel %vm461_vm7, %v577_v57, -inf  ;;  %v598_v7 = vsel %vm461_vm7, %v578_v58, -inf }
  0x5f   :  { %v528_v8 = vsel %vm100_vm3, %v489_v61, %v527_v4  ;;  %v624_v9 = vrot.slane %v623_v1, 1  ;;  %v635_v10 = vmax.f32 %v633_v56, %v634_v2  ;;  %v586_v12 = vmax.f32 %v584_v59, %v585_v3 }
  0x60   :  { %v535_v13 = vsel %vm534_vm8, %v528_v8, -inf  ;;  %v630_v14 = vmax.f32 %v628_v63, %v629_v5  ;;  %v592_v15 = vrot.slane %v591_v6, 4  ;;  %v599_v19 = vrot.slane %v598_v7, 4 }
  0x61   :  { %536 = vmax.xlane.f32.xlu0 %v535_v13  ;;  %v625_v16 = vmax.f32 %v623_v1, %v624_v9  ;;  %v636_v17 = vrot.slane %v635_v10, 2  ;;  %v587_v18 = vrot.slane %v586_v12, 2  ;;  %v556_v20 = vsel %vm555_vm9, %v528_v8, -inf }
  0x62   :  { %v631_v21 = vrot.slane %v630_v14, 1  ;;  %v593_v22 = vmax.f32 %v591_v6, %v592_v15  ;;  %v605_v23 = vsel %vm461_vm7, %v579_v11, -inf  ;;  %v600_v27 = vmax.f32 %v598_v7, %v599_v19 }
  0x63   :  { %v637_v24 = vmax.f32 %v635_v10, %v636_v17  ;;  %v651_v25 = vsel %vm96_vm1, %v625_v16, %v618_v0  ;;  %v588_v26 = vmax.f32 %v586_v12, %v587_v18  ;;  %v606_v30 = vrot.slane %v605_v23, 4 }
  0x64   :  { %v632_v28 = vmax.f32 %v630_v14, %v631_v21  ;;  %v594_v29 = vrot.slane %v593_v22, 2  ;;  %v601_v33 = vrot.slane %v600_v27, 2  ;;  %v116_v56 = vlaneseq }
  0x65   :  { %557 = vmax.xlane.f32.xlu0 %v556_v20  ;;  %v638_v31 = vrot.slane %v637_v24, 1  ;;  %v589_v32 = vrot.slane %v588_v26, 1  ;;  %v607_v36 = vmax.f32 %v605_v23, %v606_v30  ;;  %vm128_vm10 = vcmask 24576  }
  0x66   :  { %v652_v34 = vsel %vm98_vm2, %v632_v28, %v651_v25  ;;  %v595_v35 = vmax.f32 %v593_v22, %v594_v29  ;;  %v602_v38 = vmax.f32 %v600_v27, %v601_v33  ;;  %v117_v57 = vand.u32 127, %v116_v56 }
  0x67   :  { %v639_v37 = vmax.f32 %v637_v24, %v638_v31  ;;  %v590_v39 = vmax.f32 %v588_v26, %v589_v32  ;;  %v608_v41 = vrot.slane %v607_v36, 2  ;;  %v119_v58 = vshrl.u32 %v116_v56, 7 }
  0x68   :  { %v596_v40 = vrot.slane %v595_v35, 1  ;;  %v603_v43 = vrot.slane %v602_v38, 1 }
  0x69   :  { %v653_v42 = vsel %vm100_vm3, %v639_v37, %v652_v34  ;;  %v609_v46 = vmax.f32 %v607_v36, %v608_v41  ;;  %v920_v59 = vsub.s32 %v117_v57, %v119_v58 }
  0x6a   :  { %v659_v44 = vsel %vm534_vm8, %v653_v42, -inf  ;;  %v597_v45 = vmax.f32 %v595_v35, %v596_v40  ;;  %v604_v47 = vmax.f32 %v602_v38, %v603_v43  ;;  %v679_v50 = vsel %vm555_vm9, %v653_v42, -inf }
  0x6b   :  { %660 = vmax.xlane.f32.xlu1 %v659_v44  ;;  %v610_v48 = vrot.slane %v609_v46, 1 }
  0x6c   :  { %v648_v49 = vsel %vm96_vm1, %v597_v45, %v590_v39 }
  0x6d   :  { %v649_v51 = vsel %vm98_vm2, %v604_v47, %v648_v49  ;;  %v611_v52 = vmax.f32 %v609_v46, %v610_v48 }
  0x6f   :  { %680 = vmax.xlane.f32.xlu1 %v679_v50  ;;  %v650_v53 = vsel %vm100_vm3, %v611_v52, %v649_v51 }
  0x70   :  { %v656_v54 = vsel %vm534_vm8, %v650_v53, -inf  ;;  %v676_v55 = vsel %vm555_vm9, %v650_v53, -inf }
  0x71   :  { %657 = vmax.xlane.f32.xlu0 %v656_v54 }
  0x75   :  { %677 = vmax.xlane.f32.xlu0 %v676_v55 }
  0xb3   :  { %v134_v60 = vpop.xlane.xlu1 %133  ;;  %v110_v61 = vpop.xlane.xlu0 %109 }
  0xb4   :  { %v143_v62 = vrot.slane %v134_v60, %v920_v59  ;;  %v121_v63 = vrot.slane %v110_v61, %v920_v59  ;;  %v696_v26 = vmax.f32 %v110_v61, %v134_v60 }
  0xb6   :  { %150 = vst.msk [vmem:[#allocation5 + $0x6] sm:$0x1] %vm128_vm10, %v143_v62  ;;  %129 = vst.msk [vmem:[#allocation5 + $0x5] sm:$0x1] %vm128_vm10, %v121_v63 }
  0xb8   :  { %v137_v0 = vpop.xlane.xlu1 %136  ;;  %v113_v1 = vpop.xlane.xlu0 %112 }
  0xb9   :  { %v147_v2 = vrot.slane %v137_v0, %v920_v59  ;;  %v125_v3 = vrot.slane %v113_v1, %v920_v59  ;;  %v697_v17 = vmax.f32 %v113_v1, %v137_v0 }
  0xbb   :  { %151 = vst.msk [vmem:[#allocation5 + $0x16] sm:$0x1] %vm128_vm10, %v147_v2  ;;  %130 = vst.msk [vmem:[#allocation5 + $0x15] sm:$0x1] %vm128_vm10, %v125_v3 }
  0xbc   :  { %v158_v4 = vpop.xlane.xlu1 %157  ;;  %v155_v5 = vpop.xlane.xlu0 %154 }
  0xbd   :  { %v168_v6 = vrot.slane %v158_v4, %v920_v59  ;;  %v164_v7 = vrot.slane %v155_v5, %v920_v59  ;;  %v699_v19 = vmax.f32 %v697_v17, %v158_v4  ;;  %v698_v28 = vmax.f32 %v696_v26, %v155_v5 }
  0xbf   :  { %172 = vst.msk [vmem:[#allocation5 + $0x17] sm:$0x1] %vm128_vm10, %v168_v6  ;;  %171 = vst.msk [vmem:[#allocation5 + $0x7] sm:$0x1] %vm128_vm10, %v164_v7 }
  0xc4   :  { %v258_v8 = vpop.xlane.xlu1 %257 }
  0xc5   :  { %v268_v9 = vrot.slane %v258_v8, %v920_v59  ;;  %v701_v21 = vmax.f32 %v699_v19, %v258_v8 }
  0xc7   :  { %272 = vst.msk [vmem:[#allocation5 + $0x18] sm:$0x1] %vm128_vm10, %v268_v9 }
  0xc8   :  { %v278_v10 = vpop.xlane.xlu1 %277 }
  0xc9   :  { %v288_v11 = vrot.slane %v278_v10, %v920_v59  ;;  %v703_v24 = vmax.f32 %v701_v21, %v278_v10 }
  0xcb   :  { %v255_v12 = vpop.xlane.xlu0 %254  ;;  %292 = vst.msk [vmem:[#allocation5 + $0x19] sm:$0x1] %vm128_vm10, %v288_v11 }
  0xcc   :  { %v264_v13 = vrot.slane %v255_v12, %v920_v59  ;;  %v298_v14 = vpop.xlane.xlu1 %297  ;;  %v700_v32 = vmax.f32 %v698_v28, %v255_v12 }
  0xcd   :  { %v308_v15 = vrot.slane %v298_v14, %v920_v59  ;;  %v705_v27 = vmax.f32 %v703_v24, %v298_v14 }
  0xce   :  { %271 = vst.msk [vmem:[#allocation5 + $0x8] sm:$0x1] %vm128_vm10, %v264_v13 }
  0xcf   :  { %v275_v16 = vpop.xlane.xlu0 %274  ;;  %312 = vst.msk [vmem:[#allocation5 + $0x1a] sm:$0x1] %vm128_vm10, %v308_v15 }
  0xd0   :  { %v284_v18 = vrot.slane %v275_v16, %v920_v59  ;;  %v702_v35 = vmax.f32 %v700_v32, %v275_v16 }
  0xd2   :  { %291 = vst.msk [vmem:[#allocation5 + $0x9] sm:$0x1] %vm128_vm10, %v284_v18 }
  0xd3   :  { %v295_v20 = vpop.xlane.xlu0 %294 }
  0xd4   :  { %v304_v22 = vrot.slane %v295_v20, %v920_v59  ;;  %v398_v23 = vpop.xlane.xlu1 %397  ;;  %v704_v40 = vmax.f32 %v702_v35, %v295_v20 }
  0xd5   :  { %v408_v25 = vrot.slane %v398_v23, %v920_v59  ;;  %v707_v30 = vmax.f32 %v705_v27, %v398_v23 }
  0xd6   :  { %311 = vst.msk [vmem:[#allocation5 + $0xa] sm:$0x1] %vm128_vm10, %v304_v22 }
  0xd7   :  { %412 = vst.msk [vmem:[#allocation5 + $0x1b] sm:$0x1] %vm128_vm10, %v408_v25 }
  0xd8   :  { %v418_v29 = vpop.xlane.xlu1 %417 }
  0xd9   :  { %v428_v31 = vrot.slane %v418_v29, %v920_v59  ;;  %v709_v34 = vmax.f32 %v707_v30, %v418_v29 }
  0xdb   :  { %432 = vst.msk [vmem:[#allocation5 + $0x1c] sm:$0x1] %vm128_vm10, %v428_v31 }
  0xdc   :  { %v395_v33 = vpop.xlane.xlu0 %394  ;;  %v438_v37 = vpop.xlane.xlu1 %437 }
  0xdd   :  { %v404_v36 = vrot.slane %v395_v33, %v920_v59  ;;  %v448_v38 = vrot.slane %v438_v37, %v920_v59  ;;  %v711_v39 = vmax.f32 %v709_v34, %v438_v37  ;;  %v706_v43 = vmax.f32 %v704_v40, %v395_v33 }
  0xdf   :  { %411 = vst.msk [vmem:[#allocation5 + $0xb] sm:$0x1] %vm128_vm10, %v404_v36  ;;  %452 = vst.msk [vmem:[#allocation5 + $0x1d] sm:$0x1] %vm128_vm10, %v448_v38  ;;  %v721_v42 = vrot.slane %v711_v39, %v920_v59 }
  0xe0   :  { %v415_v41 = vpop.xlane.xlu0 %414 }
  0xe1   :  { %v424_v44 = vrot.slane %v415_v41, %v920_v59  ;;  %725 = vst.msk [vmem:[#allocation5 + $0x10] sm:$0x1] %vm128_vm10, %v721_v42  ;;  %v708_v45 = vmax.f32 %v706_v43, %v415_v41 }
  0xe3   :  { %431 = vst.msk [vmem:[#allocation5 + $0xc] sm:$0x1] %vm128_vm10, %v424_v44 }
  0xe4   :  { %v435_v46 = vpop.xlane.xlu0 %434 }
  0xe5   :  { %v444_v47 = vrot.slane %v435_v46, %v920_v59  ;;  %v710_v48 = vmax.f32 %v708_v45, %v435_v46 }
  0xe7   :  { %451 = vst.msk [vmem:[#allocation5 + $0xd] sm:$0x1] %vm128_vm10, %v444_v47  ;;  %v717_v49 = vrot.slane %v710_v48, %v920_v59  ;;  %v540_v50 = vpop.xlane.xlu1 %539 }
  0xe8   :  { %v550_v51 = vrot.slane %v540_v50, %v920_v59 }
  0xe9   :  { %724 = vst.msk [vmem:[#allocation5] sm:$0x1] %vm128_vm10, %v717_v49 }
  0xea   :  { %554 = vst.msk [vmem:[#allocation5 + $0x11] sm:$0x1] %vm128_vm10, %v550_v51 }
  0xeb   :  { %v561_v52 = vpop.xlane.xlu1 %560 }
  0xec   :  { %v571_v53 = vrot.slane %v561_v52, %v920_v59 }
  0xee   :  { %v537_v54 = vpop.xlane.xlu0 %536  ;;  %575 = vst.msk [vmem:[#allocation5 + $0x12] sm:$0x1] %vm128_vm10, %v571_v53 }
  0xef   :  { %v546_v55 = vrot.slane %v537_v54, %v920_v59 }
  0xf1   :  { %553 = vst.msk [vmem:[#allocation5 + $0x1] sm:$0x1] %vm128_vm10, %v546_v55 }
  0xf2   :  { %v558_v56 = vpop.xlane.xlu0 %557 }
  0xf3   :  { %v567_v57 = vrot.slane %v558_v56, %v920_v59 }
  0xf5   :  { %574 = vst.msk [vmem:[#allocation5 + $0x2] sm:$0x1] %vm128_vm10, %v567_v57 }
  0xf8   :  { %v661_v58 = vpop.xlane.xlu1 %660 }
  0xf9   :  { %v671_v60 = vrot.slane %v661_v58, %v920_v59 }
  0xfb   :  { %675 = vst.msk [vmem:[#allocation5 + $0x13] sm:$0x1] %vm128_vm10, %v671_v60 }
  0xfc   :  { %v681_v61 = vpop.xlane.xlu1 %680 }
  0xfd   :  { %v691_v62 = vrot.slane %v681_v61, %v920_v59 }
  0xfe   :  { %v658_v63 = vpop.xlane.xlu0 %657 }
  0xff   :  { %695 = vst.msk [vmem:[#allocation5 + $0x14] sm:$0x1] %vm128_vm10, %v691_v62  ;;  %v667_v0 = vrot.slane %v658_v63, %v920_v59 }
 0x101   :  { %674 = vst.msk [vmem:[#allocation5 + $0x3] sm:$0x1] %vm128_vm10, %v667_v0 }
 0x102   :  { %v678_v1 = vpop.xlane.xlu0 %677 }
 0x103   :  { %v687_v2 = vrot.slane %v678_v1, %v920_v59 }
 0x105   :  { %694 = vst.msk [vmem:[#allocation5 + $0x4] sm:$0x1] %vm128_vm10, %v687_v2 }
 0x106   :  { %780 = shalt.err (!%p777_p12)
}
 0x107   :  { %s781_s24 = scalar_lea.hbm %s994_s1, 512 }
 0x108   :  { %p782_p13 = scmp.ne.s32.totalorder %s994_s1, %s781_s24  ;;  %p785_p0 = scmp.lt.u32.totalorder %s781_s24, %s994_s1 }
 0x10a   :  { %p787_p1 = pnand %p785_p0, %p782_p13 }
 0x10c   :  { %790 = shalt.err (!%p787_p1)
}
 0x10d   :  { %737 = dma.vmem_to_hbm [thread:$0]  %s732_s20, 512, %s994_s1, [#allocation4], %s796_s16, %s796_s16, %s797_s17  }
 0x10e   :  { %793 = dma.done.wait [#allocation4], 512  }
 0x10f   :  { %794 = vsyncadd [#allocation4], 4294966784 }
 0x110   :  { %741 = vsyncpa [#allocation3], 1 }
 0x111   :  { %742 = vsyncpa [#allocation4], 1 }

</bundles_post_ra>
